<compile_context>
chip_gen: v7x
topology: tpu7x:2x2x1
jax: 0.10.0
libtpu: 0.0.40
codegen_flags: <defaults>
</compile_context>

<pallas_src>
import functools

import jax
import jax.numpy as jnp
import numpy as np
from jax import lax
from jax.experimental import pallas as pl
from jax.experimental.pallas import tpu as pltpu


def _round_up(n, m):
    return ((n + m - 1) // m) * m


def _cdiv(n, m):
    return (n + m - 1) // m


# ---------------------------------------------------------------------------
# Kernels
# ---------------------------------------------------------------------------

def _ce_single_tile_kernel(logits_ref, targets_ref, out_ref):
    """Per-sample CE when the whole class axis fits in one block (C <= tc)."""
    x = logits_ref[...].astype(jnp.float32)            # (tb, C) f32
    t = targets_ref[...]                               # (tb, 1) int32
    tb, C = x.shape

    m = jnp.max(x, axis=1, keepdims=True)
    lse = m + jnp.log(jnp.sum(jnp.exp(x - m), axis=1, keepdims=True))
    col = lax.broadcasted_iota(jnp.int32, (tb, C), 1)
    tgt = jnp.sum(jnp.where(col == t, x, 0.0), axis=1, keepdims=True)
    out_ref[...] = lse - tgt


def _ce_streaming_kernel(logits_ref, targets_ref, out_ref,
                         m_sc, l_sc, t_sc, *, C, tc):
    """Per-sample CE with a streaming (online) logsumexp over class tiles.

    Accumulators are kept per lane, shape (tb, 128); the cross-lane collapse
    happens only once in the finalize phase, so the hot loop has no XLU
    tree reductions (v7x / compute-bound win).
    """
    j = pl.program_id(1)
    nj = pl.num_programs(1)

    @pl.when(j == 0)
    def _init():
        m_sc[...] = jnp.full_like(m_sc, -1e30)
        l_sc[...] = jnp.zeros_like(l_sc)
        t_sc[...] = jnp.zeros_like(t_sc)

    t = targets_ref[...]                                # (tb, 1) int32
    tb = t.shape[0]
    n_chunks = tc // 128
    mask_tail = (C % tc) != 0                           # static python bool

    # Scalar/(tb,1)-side index shift: compare a fixed per-chunk lane iota
    # against shifted scalars instead of building iota + j*tc per element.
    t_local = t - j * tc                                # (tb, 1)
    c_valid = C - j * tc                                # traced scalar
    lane = lax.broadcasted_iota(jnp.int32, (tb, 128), 1)

    def chunk(c):
        xc = logits_ref[:, c * 128:(c + 1) * 128].astype(jnp.float32)
        if mask_tail:
            xc = jnp.where(lane < c_valid - c * 128, xc, -1e30)
        return xc

    # Pass 1: per-lane running max over this class tile (VPU-only).
    m_prev = m_sc[...]
    mx = chunk(0)
    for c in range(1, n_chunks):
        mx = jnp.maximum(mx, chunk(c))
    m_new = jnp.maximum(m_prev, mx)

    # Pass 2: rescale old sum-exp, accumulate exp and the target logit.
    l_acc = l_sc[...] * jnp.exp(m_prev - m_new)
    t_acc = t_sc[...]
    for c in range(n_chunks):
        xc = chunk(c)
        l_acc = l_acc + jnp.exp(xc - m_new)
        t_acc = t_acc + jnp.where(lane == t_local - c * 128, xc, 0.0)

    m_sc[...] = m_new
    l_sc[...] = l_acc
    t_sc[...] = t_acc

    @pl.when(j == nj - 1)
    def _finalize():
        m = m_sc[...]                                   # (tb, 128)
        l = l_sc[...]
        mrow = jnp.max(m, axis=1, keepdims=True)        # single XLU pass
        lse = mrow + jnp.log(
            jnp.sum(l * jnp.exp(m - mrow), axis=1, keepdims=True))
        tgt = jnp.sum(t_sc[...], axis=1, keepdims=True)
        out_ref[...] = lse - tgt


# ---------------------------------------------------------------------------
# Wrapper
# ---------------------------------------------------------------------------

def _pick_tiles(itemsize):
    """Generation-aware tile limits (sublane packing, max_tb, max_tc, vmem)."""
    sub = {4: 8, 2: 16, 1: 32}.get(itemsize, 8)
    try:
        kind = jax.devices()[0].device_kind.lower()
    except Exception:
        kind = ""
    is_v7 = "v7" in kind
    if "v6" in kind:
        # 8 MiB f32 blocks; bump scoped VMEM (32 MiB default, 128 MiB phys).
        max_tb, max_tc, vmem_limit = 256, 8192, 64 * 1024 * 1024
    elif "v5" in kind:
        # 4 MiB f32 blocks; fits the 16 MiB v5e scoped-VMEM default.
        max_tb, max_tc, vmem_limit = 256, 4096, None
    else:
        # v7x (64 MiB physical VMEM, compute-bound) or unknown: modest blocks.
        max_tb, max_tc, vmem_limit = 256, 4096, None
    return sub, max_tb, max_tc, vmem_limit, is_v7


def _per_sample_ce(logits, targets, *, max_tb=None, max_tc=None):
    """Per-sample cross-entropy losses, shape (B,) float32, via Pallas.

    Logits are DMA'd in their native dtype (no wrapper astype/pad passes);
    partial batch / class blocks are handled inside the kernel.
    """
    B, C = logits.shape
    itemsize = jnp.dtype(logits.dtype).itemsize
    sub, auto_tb, auto_tc, vmem_limit, is_v7 = _pick_tiles(itemsize)
    if max_tb is None:
        max_tb = auto_tb
    if max_tc is None:
        max_tc = auto_tc

    # Batch tile: multiple of the dtype's sublane packing; on v7x keep the
    # 'parallel' axis at >= 2 tiles so both TensorCores get work.
    tb = min(max_tb, _round_up(B, sub))
    if is_v7 and B > sub:
        tb = min(tb, _round_up(_cdiv(B, 2), sub))
    grid_b = _cdiv(B, tb)

    targets2d = targets.reshape(B, 1).astype(jnp.int32)
    out_shape = jax.ShapeDtypeStruct((B, 1), jnp.float32)

    if C <= max_tc:
        # Fast path: whole class axis in one block -> no scratch, no phases.
        grid = (grid_b,)
        kernel = _ce_single_tile_kernel
        in_specs = [
            pl.BlockSpec((tb, C), lambda i: (i, 0)),
            pl.BlockSpec((tb, 1), lambda i: (i, 0)),
        ]
        out_specs = pl.BlockSpec((tb, 1), lambda i: (i, 0))
        scratch_shapes = ()
        dims = ("parallel",)
    else:
        tc = max_tc
        assert tc % 128 == 0, "class tile must be a multiple of 128 lanes"
        grid = (grid_b, _cdiv(C, tc))                  # reduction axis last
        kernel = functools.partial(_ce_streaming_kernel, C=C, tc=tc)
        in_specs = [
            pl.BlockSpec((tb, tc), lambda i, j: (i, j)),
            pl.BlockSpec((tb, 1), lambda i, j: (i, 0)),
        ]
        out_specs = pl.BlockSpec((tb, 1), lambda i, j: (i, 0))
        scratch_shapes = [pltpu.VMEM((tb, 128), jnp.float32)] * 3
        dims = ("parallel", "arbitrary")

    losses = pl.pallas_call(
        kernel,
        out_shape=out_shape,
        grid_spec=pltpu.PrefetchScalarGridSpec(
            num_scalar_prefetch=0,
            grid=grid,
            in_specs=in_specs,
            out_specs=out_specs,
            scratch_shapes=scratch_shapes,
        ),
        compiler_params=pltpu.CompilerParams(
            dimension_semantics=dims,
            vmem_limit_bytes=vmem_limit),
    )(logits, targets2d)
    return losses[:, 0]


def ohem_loss(logits, targets, ratio=0.7, weight=None, reduction="mean"):
    """OHEM loss matching the PyTorch module's forward pass."""
    B = logits.shape[0]
    losses = _per_sample_ce(logits, targets)             # (B,) float32
    if weight is not None:
        # nn.CrossEntropyLoss(weight=w, reduction='none'): w[target_i] * CE_i
        losses = losses * jnp.asarray(weight, jnp.float32)[targets]
    k = int(ratio * B)
    if k == 0:
        k = 1
    # Hard-example selection over B scalars: plain XLA top-k (no serial
    # in-kernel selection loop).
    hard = lax.top_k(losses, k)[0]
    if reduction == "mean":
        return jnp.mean(hard)
    if reduction == "sum":
        return jnp.sum(hard)
    return hard                                           # reduction == 'none'


# ---------------------------------------------------------------------------
# Pure-JAX reference
# ---------------------------------------------------------------------------

def _ce_ref(logits, targets):
    x = logits.astype(jnp.float32)
    lse = jax.nn.logsumexp(x, axis=1)
    tgt = jnp.take_along_axis(x, targets[:, None].astype(jnp.int32), axis=1)[:, 0]
    return lse - tgt


def _ohem_ref(logits, targets, ratio=0.7, weight=None, reduction="mean"):
    losses = _ce_ref(logits, targets)
    if weight is not None:
        losses = losses * jnp.asarray(weight, jnp.float32)[targets]
    k = max(int(ratio * logits.shape[0]), 1)
    hard = jnp.sort(losses)[::-1][:k]
    if reduction == "mean":
        return jnp.mean(hard)
    if reduction == "sum":
        return jnp.sum(hard)
    return hard


if __name__ == "__main__":
    key = jax.random.PRNGKey(0)
    k1, k2, k3, k4, k5, k6, k7 = jax.random.split(key, 7)

    # --- test 1: module defaults (ratio=0.7, reduction='mean'), fast path ---
    B, C = 8, 32
    logits = jax.random.normal(k1, (B, C), dtype=jnp.float32)
    targets = jax.random.randint(k2, (B,), 0, C, dtype=jnp.int32)
    out = jax.block_until_ready(ohem_loss(logits, targets, ratio=0.7,
                                          reduction="mean"))
    ref = jax.block_until_ready(_ohem_ref(logits, targets, ratio=0.7,
                                          reduction="mean"))
    np.testing.assert_allclose(np.asarray(out), np.asarray(ref),
                               rtol=1e-5, atol=1e-5)

    # --- test 2: bf16 logits (native-dtype DMA), non-multiple-of-sublane
    #     batch, per-class weight, 'sum' reduction (fast path) ---
    B2, C2 = 10, 200
    logits2 = jax.random.normal(k3, (B2, C2), dtype=jnp.float32
                                ).astype(jnp.bfloat16)
    targets2 = jax.random.randint(k4, (B2,), 0, C2, dtype=jnp.int32)
    weight2 = jax.random.uniform(k5, (C2,), minval=0.5, maxval=1.5,
                                 dtype=jnp.float32)
    out2 = jax.block_until_ready(ohem_loss(logits2, targets2, ratio=0.5,
                                           weight=weight2, reduction="sum"))
    ref2 = jax.block_until_ready(_ohem_ref(logits2, targets2, ratio=0.5,
                                           weight=weight2, reduction="sum"))
    np.testing.assert_allclose(np.asarray(out2), np.asarray(ref2),
                               rtol=1e-5, atol=1e-5)

    # --- test 3: force the streaming (multi class-tile) path with partial
    #     class and batch blocks, check per-sample CE against reference ---
    B3, C3 = 12, 700
    logits3 = jax.random.normal(k6, (B3, C3), dtype=jnp.float32)
    targets3 = jax.random.randint(k7, (B3,), 0, C3, dtype=jnp.int32)
    ce3 = jax.block_until_ready(
        _per_sample_ce(logits3, targets3, max_tb=8, max_tc=256))
    ce3_ref = jax.block_until_ready(_ce_ref(logits3, targets3))
    np.testing.assert_allclose(np.asarray(ce3), np.asarray(ce3_ref),
                               rtol=2e-5, atol=2e-5)

    print("KERNEL_OK")
</pallas_src>

<mosaic_0001>
module attributes {stable_mosaic.version = 11 : i64} {
  func.func @_ce_single_tile_kernel(%arg0: i32, %arg1: memref<8x32xf32, #tpu.memory_space<vmem>>, %arg2: memref<8x1xi32, #tpu.memory_space<vmem>>, %arg3: memref<8x1xf32, #tpu.memory_space<vmem>>) attributes {dimension_semantics = [#tpu.dimension_semantics<parallel>], iteration_bounds = array<i64: 1>, scalar_prefetch = 0 : i64, scratch_operands = 0 : i64, tpu.core_type = #tpu.core_type<tc>, window_params = [{transform_indices = @transform_0, window_bounds = array<i64: 8, 32>}, {transform_indices = @transform_1, window_bounds = array<i64: 8, 1>}, {transform_indices = @transform_2, window_bounds = array<i64: 8, 1>}]} {
    %c0 = arith.constant 0 : index
    %c0_0 = arith.constant 0 : index
    %0 = vector.load %arg1[%c0, %c0_0] : memref<8x32xf32, #tpu.memory_space<vmem>>, vector<8x32xf32>
    %c0_1 = arith.constant 0 : index
    %c0_2 = arith.constant 0 : index
    %1 = vector.load %arg2[%c0_1, %c0_2] : memref<8x1xi32, #tpu.memory_space<vmem>>, vector<8x1xi32>
    %cst = arith.constant dense<0xFF800000> : vector<8xf32>
    %2 = vector.multi_reduction <maximumf>, %0, %cst [1] : vector<8x32xf32> to vector<8xf32>
    %3 = vector.shape_cast %2 : vector<8xf32> to vector<8x1xf32>
    %4 = vector.broadcast %3 : vector<8x1xf32> to vector<8x32xf32>
    %5 = arith.subf %0, %4 : vector<8x32xf32>
    %6 = math.exp %5 : vector<8x32xf32>
    %cst_3 = arith.constant dense<0.000000e+00> : vector<8xf32>
    %7 = vector.multi_reduction <add>, %6, %cst_3 [1] : vector<8x32xf32> to vector<8xf32>
    %8 = vector.shape_cast %7 : vector<8xf32> to vector<8x1xf32>
    %9 = math.log %8 : vector<8x1xf32>
    %10 = arith.addf %3, %9 : vector<8x1xf32>
    %11 = tpu.iota {dimensions = array<i32: 1>} : vector<8x32xi32>
    %12 = vector.broadcast %1 : vector<8x1xi32> to vector<8x32xi32>
    %13 = arith.cmpi eq, %11, %12 : vector<8x32xi32>
    %cst_4 = arith.constant 0.000000e+00 : f32
    %14 = vector.broadcast %cst_4 : f32 to vector<8x32xf32>
    %15 = arith.select %13, %0, %14 : vector<8x32xi1>, vector<8x32xf32>
    %cst_5 = arith.constant dense<0.000000e+00> : vector<8xf32>
    %16 = vector.multi_reduction <add>, %15, %cst_5 [1] : vector<8x32xf32> to vector<8xf32>
    %17 = vector.shape_cast %16 : vector<8xf32> to vector<8x1xf32>
    %18 = arith.subf %10, %17 : vector<8x1xf32>
    %c0_6 = arith.constant 0 : index
    %c0_7 = arith.constant 0 : index
    %19 = vector.load %arg3[%c0_6, %c0_7] : memref<8x1xf32, #tpu.memory_space<vmem>>, vector<8x1xf32>
    tpu.vector_store %arg3[%c0_6, %c0_7], %18 {strides = array<i32>} : memref<8x1xf32, #tpu.memory_space<vmem>>, vector<8x1xf32>,
    return
  }
  func.func @transform_0(%arg0: i32) -> (i32, i32) {
    %c0_i32 = arith.constant 0 : i32
    %c0_i32_0 = arith.constant 0 : i32
    return %arg0, %c0_i32 : i32, i32
  }
  func.func @transform_1(%arg0: i32) -> (i32, i32) {
    %c0_i32 = arith.constant 0 : i32
    %c0_i32_0 = arith.constant 0 : i32
    return %arg0, %c0_i32 : i32, i32
  }
  func.func @transform_2(%arg0: i32) -> (i32, i32) {
    %c0_i32 = arith.constant 0 : i32
    %c0_i32_0 = arith.constant 0 : i32
    return %arg0, %c0_i32 : i32, i32
  }
}

</mosaic_0001>

<bundles_post_ra>
// kernel: tpu_custom_call.1
= control target key start
LH: loop header
LB: loop body
LE: loop exit
PB: predicated region body
PF: predicated region fallthrough
CT: control target
= control target key end

     0   :  { %vm13_vm0 = vcmask 261120   ;;  %v49_v1 = vmov 0   ;;  %v26_v7 = vlaneseq  ;;  %vm37_vm2 = vcmask 7168   ;;  %s77_s0 = inlined_call_operand.vmem [shape: f32[8,32], index: 0, kind: input, shape index: {}]   ;;  %s78_s1 = inlined_call_operand.vmem [shape: s32[8,1], index: 1, kind: input, shape index: {}]   ;;  %s79_s2 = inlined_call_operand.vmem [shape: f32[8,1], index: 2, kind: output, shape index: {}]  }
   0x1   :  { %v11_v0 = vld [vmem:[%s77_s0] sm:$0xff]  ;;  %44 = vset.pattern.permute.xlu0 %v49_v1 }
   0x2   :  { %v14_v2 = vsel %vm13_vm0, %v11_v0, -inf  ;;  %v12_v3 = vld [vmem:[%s78_s1] sm:$0xff]  ;;  %v27_v8 = vand.u32 127, %v26_v7 }
   0x3   :  { %15 = vmax.xlane.f32.xlu0 %v14_v2 }
  0x19   :  { %29 = vperm.xlu0 %44, %v12_v3  }
  0x90   :  { %v16_v4 = vpop.xlane.xlu0 %15 }
  0x91   :  { %v17_v5 = vsub.f32 %v11_v0, %v16_v4 }
  0x93   :  { %v18_v6 = vmul.f32 1.442695, %v17_v5 }
  0x95   :  { %45 = vpow2.f32 %v18_v6 }
  0x98   :  { %v30_v9 = vpop.permute.xlu0 %29 }
  0x99   :  { %vm31_vm1 = vcmp.eq.s32.totalorder %v27_v8, %v30_v9 }
  0x9a   :  { %v32_v11 = vsel %vm31_vm1, %v11_v0, 0.0 }
  0x9b   :  { %v33_v13 = vsel %vm13_vm0, %v32_v11, 0.0 }
  0x9f   :  { %v46_v10 = vpop.eup %45 }
  0xa0   :  { %v20_v12 = vsel %vm13_vm0, %v46_v10, 0.0 }
  0xa1   :  { %21 = vadd.xlane.f32.xlu1 %v20_v12 }
  0xa5   :  { %34 = vadd.xlane.f32.xlu1 %v33_v13 }
 0x12e   :  { %v22_v14 = vpop.xlane.xlu1 %21 }
 0x12f   :  { %47 = vlog2.f32 %v22_v14 }
 0x132   :  { %v35_v17 = vpop.xlane.xlu1 %34 }
 0x139   :  { %v48_v15 = vpop.eup %47 }
 0x13a   :  { %v24_v16 = vmul.f32 0.6931472, %v48_v15 }
 0x13c   :  { %v25_v18 = vadd.f32 %v24_v16, %v16_v4 }
 0x13e   :  { %v36_v19 = vsub.f32 %v25_v18, %v35_v17 }
 0x140   :  { %38 = vst.msk [vmem:[%s79_s2] sm:$0xff] %vm37_vm2, %v36_v19 }

</bundles_post_ra>
